<compile_context>
chip_gen: v7x
topology: tpu7x:2x2x1
jax: 0.10.0
libtpu: 0.0.40
codegen_flags: <defaults>
</compile_context>

<pallas_src>
import jax
import jax.numpy as jnp
from jax import lax
from jax.experimental import pallas as pl
from jax.experimental.pallas import tpu as pltpu

DEFAULT_THRESHOLD = 0.005


# ---------------------------------------------------------------------------
# Main kernel: out = x @ W^T + xlm @ RM + bias, tiled over (M, N, in)
# ---------------------------------------------------------------------------
def _rg_linear_kernel(x_ref, w_ref, xlm_ref, rm_ref, b_ref, o_ref):
    k = pl.program_id(2)

    @pl.when(k == 0)
    def _():
        o_ref[...] = jnp.zeros_like(o_ref)

    # x @ W^T without materializing a transpose: contract the last dims of both
    # operands on the MXU; accumulate directly into the k-resident output tile.
    o_ref[...] += lax.dot_general(
        x_ref[...], w_ref[...],
        dimension_numbers=(((1,), (1,)), ((), ())),
        preferred_element_type=jnp.float32)                      # (TM, TN) f32

    @pl.when(k == pl.num_programs(2) - 1)
    def _():
        low = jnp.dot(xlm_ref[...], rm_ref[...],
                      preferred_element_type=jnp.float32)        # (TM, TN) f32
        o_ref[...] += low + b_ref[...].astype(jnp.float32)


# ---------------------------------------------------------------------------
# Wrapper
# ---------------------------------------------------------------------------
def _round_up(n, m):
    return ((n + m - 1) // m) * m


def elementwise_rg_forward(x, weight, bias, lm_base, rm_base,
                           mask_real_lm=None, mask_real_rm=None, task=0,
                           compute_dtype=jnp.bfloat16):
    """x: (..., in_features). Returns (..., out_features) in float32.
    `task` is a Python int. compute_dtype controls the matmul operand dtype
    (bf16 fast path by default; accumulation is always f32)."""
    in_features, K = lm_base.shape
    out_features = rm_base.shape[1]

    lead_shape = x.shape[:-1]
    x2d = x.reshape(-1, in_features)
    M = x2d.shape[0]

    # Binarizer piggyback masks (x-independent). Plain jnp: XLA fuses the
    # compare+select; a dedicated pallas_call on these tiny factors only adds
    # launch overhead and an HBM round-trip.
    if task == 0:
        lm = lm_base
        rm = rm_base
    else:
        lm = jnp.where(mask_real_lm > DEFAULT_THRESHOLD,
                       lm_base, jnp.zeros_like(lm_base))
        rm = jnp.where(mask_real_rm > DEFAULT_THRESHOLD,
                       rm_base, jnp.zeros_like(rm_base))

    x_c = x2d.astype(compute_dtype)
    w_c = weight.astype(compute_dtype)
    rm_c = rm.astype(compute_dtype)

    # Hoisted out of the main grid: xlm = x @ LM is independent of the output
    # column tile j, so compute it once (thin matmul) instead of N/TN times.
    xlm = jnp.dot(x_c, lm.astype(compute_dtype),
                  preferred_element_type=jnp.float32).astype(compute_dtype)

    if bias is None:
        bias2d = jnp.zeros((1, out_features), jnp.float32)
    else:
        bias2d = bias.reshape(1, out_features).astype(jnp.float32)

    # Tile targets; every dim is zero-padded to a multiple of its tile so the
    # VMEM footprint is predictable (no full-dim fallback cliffs).
    is_bf16 = jnp.dtype(compute_dtype) == jnp.dtype(jnp.bfloat16)
    sub_align = 16 if is_bf16 else 8
    TM = min(512, _round_up(M, sub_align))
    TN = min(512, _round_up(out_features, 128))    # lane-dense output tiles
    TK = min(2048, _round_up(in_features, 128))    # fewer k steps, fewer acc RMWs
    KR = _round_up(K, 128)                         # lane-dense low-rank dim

    Mp = _round_up(M, TM)
    Np = _round_up(out_features, TN)
    Kp = _round_up(in_features, TK)

    x_p = jnp.pad(x_c, ((0, Mp - M), (0, Kp - in_features)))
    w_p = jnp.pad(w_c, ((0, Np - out_features), (0, Kp - in_features)))
    xlm_p = jnp.pad(xlm, ((0, Mp - M), (0, KR - K)))
    rm_p = jnp.pad(rm_c, ((0, KR - K), (0, Np - out_features)))
    b_p = jnp.pad(bias2d, ((0, 0), (0, Np - out_features)))

    grid = (Mp // TM, Np // TN, Kp // TK)

    out2d = pl.pallas_call(
        _rg_linear_kernel,
        out_shape=jax.ShapeDtypeStruct((Mp, Np), jnp.float32),
        grid_spec=pltpu.PrefetchScalarGridSpec(
            num_scalar_prefetch=0,
            grid=grid,
            in_specs=[
                pl.BlockSpec((TM, TK), lambda i, j, k: (i, k)),   # x
                pl.BlockSpec((TN, TK), lambda i, j, k: (j, k)),   # weight (out, in)
                pl.BlockSpec((TM, KR), lambda i, j, k: (i, 0)),   # precomputed x @ LM
                pl.BlockSpec((KR, TN), lambda i, j, k: (0, j)),   # masked RM
                pl.BlockSpec((1, TN), lambda i, j, k: (0, j)),    # bias
            ],
            out_specs=pl.BlockSpec((TM, TN), lambda i, j, k: (i, j)),
        ),
        compiler_params=pltpu.CompilerParams(
            dimension_semantics=("parallel", "parallel", "arbitrary"),
            vmem_limit_bytes=48 * 1024 * 1024,
        ),
    )(x_p, w_p, xlm_p, rm_p, b_p)

    out2d = out2d[:M, :out_features]
    return out2d.reshape(*lead_shape, out_features)


# ---------------------------------------------------------------------------
# Pure-JAX reference mirroring the PyTorch forward (default branch)
# ---------------------------------------------------------------------------
def _reference_forward(x, weight, bias, lm_base, rm_base,
                       mask_real_lm, mask_real_rm, task):
    if task == 0:
        lm, rm = lm_base, rm_base
    else:
        mlm = (mask_real_lm > DEFAULT_THRESHOLD).astype(jnp.float32)
        mrm = (mask_real_rm > DEFAULT_THRESHOLD).astype(jnp.float32)
        lm, rm = mlm * lm_base, mrm * rm_base
    R = lm @ rm                    # (in, out)
    w_eff = R.T + weight           # (out, in)
    out = x @ w_eff.T
    if bias is not None:
        out = out + bias
    return out


if __name__ == "__main__":
    key = jax.random.PRNGKey(0)
    k1, k2, k3, k4, k5, k6 = jax.random.split(key, 6)

    batch, seq = 2, 8
    in_features, out_features, K = 32, 32, 8
    rkr_scale = 0.1
    mask_scale = 0.01          # mask_init='uniform'
    task = 1

    # Deterministic synthetic parameter init (kaiming_uniform-style bounds).
    bound_w = (6.0 / in_features) ** 0.5
    weight = jax.random.uniform(k1, (out_features, in_features),
                                minval=-bound_w, maxval=bound_w,
                                dtype=jnp.float32)
    bias = jax.random.normal(k2, (out_features,), dtype=jnp.float32)

    bound_lm = (6.0 / in_features) ** 0.5
    bound_rm = (6.0 / K) ** 0.5
    lm_base = rkr_scale * jax.random.uniform(
        k3, (in_features, K), minval=-bound_lm, maxval=bound_lm,
        dtype=jnp.float32)
    rm_base = rkr_scale * jax.random.uniform(
        k4, (K, out_features), minval=-bound_rm, maxval=bound_rm,
        dtype=jnp.float32)

    mask_real_lm = jax.random.uniform(
        k5, (in_features, K), minval=-mask_scale, maxval=mask_scale,
        dtype=jnp.float32)
    mask_real_rm = jax.random.uniform(
        k6, (K, out_features), minval=-mask_scale, maxval=mask_scale,
        dtype=jnp.float32)

    x = jax.random.normal(jax.random.PRNGKey(42),
                          (batch, seq, in_features), dtype=jnp.float32)

    ref1 = _reference_forward(x, weight, bias, lm_base, rm_base,
                              mask_real_lm, mask_real_rm, task=1)
    ref0 = _reference_forward(x, weight, bias, lm_base, rm_base,
                              mask_real_lm, mask_real_rm, task=0)

    # f32 compute path — exact structural check against the reference.
    out1_f32 = jax.block_until_ready(
        elementwise_rg_forward(x, weight, bias, lm_base, rm_base,
                               mask_real_lm, mask_real_rm, task=1,
                               compute_dtype=jnp.float32))
    assert out1_f32.shape == (batch, seq, out_features)
    assert jnp.allclose(out1_f32, ref1, atol=1e-5, rtol=1e-5), \
        "mismatch vs reference (task=1, f32)"

    out0_f32 = jax.block_until_ready(
        elementwise_rg_forward(x, weight, bias, lm_base, rm_base,
                               mask_real_lm, mask_real_rm, task=0,
                               compute_dtype=jnp.float32))
    assert jnp.allclose(out0_f32, ref0, atol=1e-5, rtol=1e-5), \
        "mismatch vs reference (task=0, f32)"

    # bf16 fast path (default) — loosened tolerance for bf16 operands.
    out1_bf16 = jax.block_until_ready(
        elementwise_rg_forward(x, weight, bias, lm_base, rm_base,
                               mask_real_lm, mask_real_rm, task=1))
    assert jnp.allclose(out1_bf16, ref1, atol=5e-2, rtol=5e-2), \
        "mismatch vs reference (task=1, bf16)"

    out0_bf16 = jax.block_until_ready(
        elementwise_rg_forward(x, weight, bias, lm_base, rm_base,
                               mask_real_lm, mask_real_rm, task=0))
    assert jnp.allclose(out0_bf16, ref0, atol=5e-2, rtol=5e-2), \
        "mismatch vs reference (task=0, bf16)"

    # TODO(synk): Ternarizer / RGnoPB / LMnoPB / RMnoPB / PBwR config branches are
    # variants of the same mask + low-rank-matmul pattern and are not wired here.
    print("KERNEL_OK")
</pallas_src>

<mosaic_0001>
module attributes {stable_mosaic.version = 11 : i64} {
  func.func @_rg_linear_kernel(%arg0: i32, %arg1: i32, %arg2: i32, %arg3: memref<16x128xf32, #tpu.memory_space<vmem>>, %arg4: memref<128x128xf32, #tpu.memory_space<vmem>>, %arg5: memref<16x128xf32, #tpu.memory_space<vmem>>, %arg6: memref<128x128xf32, #tpu.memory_space<vmem>>, %arg7: memref<1x128xf32, #tpu.memory_space<vmem>>, %arg8: memref<16x128xf32, #tpu.memory_space<vmem>>) attributes {dimension_semantics = [#tpu.dimension_semantics<parallel>, #tpu.dimension_semantics<parallel>, #tpu.dimension_semantics<arbitrary>], iteration_bounds = array<i64: 1, 1, 1>, scalar_prefetch = 0 : i64, scratch_operands = 0 : i64, tpu.core_type = #tpu.core_type<tc>, window_params = [{transform_indices = @transform_0, window_bounds = array<i64: 16, 128>}, {transform_indices = @transform_1, window_bounds = array<i64: 128, 128>}, {transform_indices = @transform_2, window_bounds = array<i64: 16, 128>}, {transform_indices = @transform_3, window_bounds = array<i64: 128, 128>}, {transform_indices = @transform_4, window_bounds = array<i64: 1, 128>}, {transform_indices = @transform_5, window_bounds = array<i64: 16, 128>}]} {
    %c0_i32 = arith.constant 0 : i32
    %0 = arith.cmpi eq, %arg2, %c0_i32 : i32
    %1 = arith.extui %0 : i1 to i32
    %c0_i32_0 = arith.constant 0 : i32
    %2 = arith.cmpi ne, %1, %c0_i32_0 : i32
    scf.if %2 {
      %cst_10 = arith.constant 0.000000e+00 : f32
      %12 = vector.broadcast %cst_10 : f32 to vector<16x128xf32>
      %c0_11 = arith.constant 0 : index
      %c0_12 = arith.constant 0 : index
      %13 = vector.load %arg8[%c0_11, %c0_12] : memref<16x128xf32, #tpu.memory_space<vmem>>, vector<16x128xf32>
      tpu.vector_store %arg8[%c0_11, %c0_12], %12 {strides = array<i32>} : memref<16x128xf32, #tpu.memory_space<vmem>>, vector<16x128xf32>,
    } else {
    }
    %c0 = arith.constant 0 : index
    %c0_1 = arith.constant 0 : index
    %3 = vector.load %arg8[%c0, %c0_1] : memref<16x128xf32, #tpu.memory_space<vmem>>, vector<16x128xf32>
    %c0_2 = arith.constant 0 : index
    %c0_3 = arith.constant 0 : index
    %4 = vector.load %arg3[%c0_2, %c0_3] : memref<16x128xf32, #tpu.memory_space<vmem>>, vector<16x128xf32>
    %c0_4 = arith.constant 0 : index
    %c0_5 = arith.constant 0 : index
    %5 = vector.load %arg4[%c0_4, %c0_5] : memref<128x128xf32, #tpu.memory_space<vmem>>, vector<128x128xf32>
    %cst = arith.constant dense<0.000000e+00> : vector<16x128xf32>
    %6 = tpu.matmul %4, %5, %cst {dimension_numbers = #tpu.dot_dimension_numbers<[1], [1], [0], [0], [0, 0, 1, 0], [], []>} : vector<16x128xf32>, vector<128x128xf32>, vector<16x128xf32> -> vector<16x128xf32>
    %7 = arith.addf %3, %6 : vector<16x128xf32>
    %c0_6 = arith.constant 0 : index
    %c0_7 = arith.constant 0 : index
    %8 = vector.load %arg8[%c0_6, %c0_7] : memref<16x128xf32, #tpu.memory_space<vmem>>, vector<16x128xf32>
    tpu.vector_store %arg8[%c0_6, %c0_7], %7 {strides = array<i32>} : memref<16x128xf32, #tpu.memory_space<vmem>>, vector<16x128xf32>,
    %c0_i32_8 = arith.constant 0 : i32
    %9 = arith.cmpi eq, %arg2, %c0_i32_8 : i32
    %10 = arith.extui %9 : i1 to i32
    %c0_i32_9 = arith.constant 0 : i32
    %11 = arith.cmpi ne, %10, %c0_i32_9 : i32
    scf.if %11 {
      %c0_10 = arith.constant 0 : index
      %c0_11 = arith.constant 0 : index
      %12 = vector.load %arg5[%c0_10, %c0_11] : memref<16x128xf32, #tpu.memory_space<vmem>>, vector<16x128xf32>
      %c0_12 = arith.constant 0 : index
      %c0_13 = arith.constant 0 : index
      %13 = vector.load %arg6[%c0_12, %c0_13] : memref<128x128xf32, #tpu.memory_space<vmem>>, vector<128x128xf32>
      %cst_14 = arith.constant dense<0.000000e+00> : vector<16x128xf32>
      %14 = tpu.matmul %12, %13, %cst_14 {dimension_numbers = #tpu.dot_dimension_numbers<[1], [0], [0], [1], [0, 0, 1, 1], [], []>} : vector<16x128xf32>, vector<128x128xf32>, vector<16x128xf32> -> vector<16x128xf32>
      %c0_15 = arith.constant 0 : index
      %c0_16 = arith.constant 0 : index
      %15 = vector.load %arg8[%c0_15, %c0_16] : memref<16x128xf32, #tpu.memory_space<vmem>>, vector<16x128xf32>
      %c0_17 = arith.constant 0 : index
      %c0_18 = arith.constant 0 : index
      %16 = vector.load %arg7[%c0_17, %c0_18] : memref<1x128xf32, #tpu.memory_space<vmem>>, vector<1x128xf32>
      %17 = vector.broadcast %16 : vector<1x128xf32> to vector<16x128xf32>
      %18 = arith.addf %14, %17 : vector<16x128xf32>
      %19 = arith.addf %15, %18 : vector<16x128xf32>
      %c0_19 = arith.constant 0 : index
      %c0_20 = arith.constant 0 : index
      %20 = vector.load %arg8[%c0_19, %c0_20] : memref<16x128xf32, #tpu.memory_space<vmem>>, vector<16x128xf32>
      tpu.vector_store %arg8[%c0_19, %c0_20], %19 {strides = array<i32>} : memref<16x128xf32, #tpu.memory_space<vmem>>, vector<16x128xf32>,
    } else {
    }
    return
  }
  func.func @transform_0(%arg0: i32, %arg1: i32, %arg2: i32) -> (i32, i32) {
    %c0_i32 = arith.constant 0 : i32
    return %arg0, %arg2 : i32, i32
  }
  func.func @transform_1(%arg0: i32, %arg1: i32, %arg2: i32) -> (i32, i32) {
    %c0_i32 = arith.constant 0 : i32
    return %arg1, %arg2 : i32, i32
  }
  func.func @transform_2(%arg0: i32, %arg1: i32, %arg2: i32) -> (i32, i32) {
    %c0_i32 = arith.constant 0 : i32
    %c0_i32_0 = arith.constant 0 : i32
    return %arg0, %c0_i32 : i32, i32
  }
  func.func @transform_3(%arg0: i32, %arg1: i32, %arg2: i32) -> (i32, i32) {
    %c0_i32 = arith.constant 0 : i32
    %c0_i32_0 = arith.constant 0 : i32
    return %c0_i32, %arg1 : i32, i32
  }
  func.func @transform_4(%arg0: i32, %arg1: i32, %arg2: i32) -> (i32, i32) {
    %c0_i32 = arith.constant 0 : i32
    %c0_i32_0 = arith.constant 0 : i32
    return %c0_i32, %arg1 : i32, i32
  }
  func.func @transform_5(%arg0: i32, %arg1: i32, %arg2: i32) -> (i32, i32) {
    %c0_i32 = arith.constant 0 : i32
    return %arg0, %arg1 : i32, i32
  }
}

</mosaic_0001>

<bundles_post_ra>
// kernel: tpu_custom_call.1
= control target key start
LH: loop header
LB: loop body
LE: loop exit
PB: predicated region body
PF: predicated region fallthrough
CT: control target
= control target key end

     0   :  { %10 = vsyncpa [#allocation3], 0  ;;  %s749_s0 = inlined_call_operand.hbm [shape: f32[16,128], index: 0, kind: input, shape index: {}]   ;;  %s750_s1 = inlined_call_operand.hbm [shape: f32[128,128], index: 1, kind: input, shape index: {}]   ;;  %s751_s2 = inlined_call_operand.hbm [shape: f32[16,128], index: 2, kind: input, shape index: {}]   ;;  %s752_s3 = inlined_call_operand.hbm [shape: f32[128,128], index: 3, kind: input, shape index: {}]   ;;  %s753_s4 = inlined_call_operand.vmem [shape: f32[1,128], index: 4, kind: input, shape index: {}]   ;;  %s754_s5 = inlined_call_operand.hbm [shape: f32[16,128], index: 5, kind: output, shape index: {}]  }
   0x1   :  { %11 = vsyncpa [#allocation6], 0 }
   0x2   :  { %12 = vsyncpa [#allocation9], 0 }
   0x3   :  { %13 = vsyncpa [#allocation4], 0  ;;  %s620_s18 = smov [#allocation5]   ;;  %s621_s20 = smov [#allocation2]  }
   0x4   :  { %s31_s19 = sshll.u32 %s620_s18, 4  ;;  %s19_s21 = sshll.u32 %s621_s20, 4  ;;  %s32_s19 = int_to_ptr.vmem [resolvable:$true] %s31_s19  ;;  %s657_s21 = int_to_ptr.vmem [resolvable:$true] %s19_s21 }
   0x5   :  { %s502_s24 = scalar_lea.hbm %s750_s1, 2048 }
   0x6   :  { %p503_p0 = scmp.ne.s32.totalorder %s750_s1, %s502_s24  ;;  %p506_p1 = scmp.lt.u32.totalorder %s502_s24, %s750_s1 }
   0x8   :  { %p508_p2 = pnand %p506_p1, %p503_p0 }
   0xa   :  { %511 = shalt.err (!%p508_p2)
}
   0xb   :  { %s512_s29 = scalar_lea.vmem %s32_s19, 2048  ;;  %p517_p4 = scmp.lt.s32.totalorder %s32_s19, %s32_s19 }
   0xc   :  { %p513_p3 = scmp.ne.s32.totalorder %s32_s19, %s512_s29  ;;  %p518_p5 = scmp.lt.s32.totalorder %s512_s29, %s512_s29 }
   0xe   :  { %p519_p6 = por %p518_p5, %p517_p4 }
  0x10   :  { %p520_p7 = pnand %p519_p6, %p513_p3 }
  0x12   :  { %523 = shalt.err (!%p520_p7)
}
  0x13   :  { %s622_s30 = smov 128   ;;  %s623_s6 = smov 8  }
  0x14   :  { %37 = dma.hbm_to_vmem [thread:$0]  %s750_s1, 2048, %s32_s19, [#allocation6], %s622_s30, %s622_s30, %s623_s6  }
  0x15   :  { %s524_s11 = scalar_lea.hbm %s749_s0, 256 }
  0x16   :  { %p525_p8 = scmp.ne.s32.totalorder %s749_s0, %s524_s11  ;;  %p528_p9 = scmp.lt.u32.totalorder %s524_s11, %s749_s0 }
  0x18   :  { %p530_p10 = pnand %p528_p9, %p525_p8 }
  0x1a   :  { %533 = shalt.err (!%p530_p10)
}
  0x1b   :  { %s534_s16 = scalar_lea.vmem %s657_s21, 256  ;;  %p539_p12 = scmp.lt.s32.totalorder %s657_s21, %s657_s21 }
  0x1c   :  { %p535_p11 = scmp.ne.s32.totalorder %s657_s21, %s534_s16  ;;  %p540_p13 = scmp.lt.s32.totalorder %s534_s16, %s534_s16 }
  0x1e   :  { %p541_p0 = por %p540_p13, %p539_p12 }
  0x20   :  { %p542_p1 = pnand %p541_p0, %p535_p11 }
  0x22   :  { %545 = shalt.err (!%p542_p1)
}
  0x23   :  { %25 = dma.hbm_to_vmem [thread:$0]  %s749_s0, 256, %s657_s21, [#allocation3], %s622_s30, %s622_s30, %s623_s6  }
  0x24   :  { %s624_s18 = smov [#allocation7]   ;;  %s625_s20 = smov [#allocation8]  }
  0x25   :  { %s43_s19 = sshll.u32 %s624_s18, 4  ;;  %s55_s22 = sshll.u32 %s625_s20, 4  ;;  %s44_s19 = int_to_ptr.vmem [resolvable:$true] %s43_s19  ;;  %s694_s22 = int_to_ptr.vmem [resolvable:$true] %s55_s22 }
  0x26   :  { %s546_s25 = scalar_lea.hbm %s751_s2, 256 }
  0x27   :  { %p547_p2 = scmp.ne.s32.totalorder %s751_s2, %s546_s25  ;;  %p550_p3 = scmp.lt.u32.totalorder %s546_s25, %s751_s2 }
  0x29   :  { %p552_p4 = pnand %p550_p3, %p547_p2 }
  0x2b   :  { %555 = shalt.err (!%p552_p4)
}
  0x2c   :  { %s556_s0 = scalar_lea.vmem %s44_s19, 256  ;;  %p561_p6 = scmp.lt.s32.totalorder %s44_s19, %s44_s19 }
  0x2d   :  { %p557_p5 = scmp.ne.s32.totalorder %s44_s19, %s556_s0  ;;  %p562_p7 = scmp.lt.s32.totalorder %s556_s0, %s556_s0 }
  0x2f   :  { %p563_p8 = por %p562_p7, %p561_p6 }
  0x31   :  { %p564_p9 = pnand %p563_p8, %p557_p5 }
  0x33   :  { %567 = shalt.err (!%p564_p9)
}
  0x34   :  { %49 = dma.hbm_to_vmem [thread:$0]  %s751_s2, 256, %s44_s19, [#allocation6], %s622_s30, %s622_s30, %s623_s6  }
  0x35   :  { %s568_s10 = scalar_lea.hbm %s752_s3, 2048 }
  0x36   :  { %p569_p10 = scmp.ne.s32.totalorder %s752_s3, %s568_s10  ;;  %p572_p11 = scmp.lt.u32.totalorder %s568_s10, %s752_s3 }
  0x38   :  { %p574_p12 = pnand %p572_p11, %p569_p10 }
  0x3a   :  { %577 = shalt.err (!%p574_p12)
}
  0x3b   :  { %s578_s15 = scalar_lea.vmem %s694_s22, 2048  ;;  %p583_p0 = scmp.lt.s32.totalorder %s694_s22, %s694_s22 }
  0x3c   :  { %p579_p13 = scmp.ne.s32.totalorder %s694_s22, %s578_s15  ;;  %p584_p1 = scmp.lt.s32.totalorder %s578_s15, %s578_s15 }
  0x3e   :  { %p585_p2 = por %p584_p1, %p583_p0 }
  0x40   :  { %p586_p3 = pnand %p585_p2, %p579_p13 }
  0x42   :  { %589 = shalt.err (!%p586_p3)
}
  0x43   :  { %61 = dma.hbm_to_vmem [thread:$0]  %s752_s3, 2048, %s694_s22, [#allocation9], %s622_s30, %s622_s30, %s623_s6  }
  0x44   :  { %612 = dma.done.wait [#allocation3], 256  }
  0x45   :  { %613 = vsyncadd [#allocation3], 4294967040 }
  0x46   :  { %614 = dma.done.wait [#allocation6], 2304  }
  0x47   :  { %615 = vsyncadd [#allocation6], 4294964992 }
  0x48   :  { %616 = dma.done.wait [#allocation9], 2048  }
  0x49   :  { %617 = vsyncadd [#allocation9], 4294965248  ;;  %v86_v0 = vld [vmem:[#allocation5] sm:$0xff]  ;;  %v87_v1 = vld [vmem:[#allocation5 + $0x8] sm:$0xff]  ;;  %s626_s17 = smov [#allocation10]  }
  0x4a   :  { %v88_v2 = vld [vmem:[#allocation5 + $0x10] sm:$0xff]  ;;  %v416_v3 = vpack.c.bf16 %v87_v1, %v86_v0  ;;  %v89_v4 = vld [vmem:[#allocation5 + $0x18] sm:$0xff]  ;;  %v188_v8 = vld [vmem:[#allocation8 + $0x10] sm:$0xff]  ;;  %s295_s18 = sshll.u32 %s626_s17, 4  ;;  %s296_s18 = int_to_ptr.vmem [resolvable:$true] %s295_s18 }
  0x4b   :  { %v420_v5 = vpack.c.bf16 %v89_v4, %v88_v2  ;;  %v186_v6 = vld [vmem:[#allocation8] sm:$0xff]  ;;  %v187_v7 = vld [vmem:[#allocation8 + $0x8] sm:$0xff]  ;;  %v90_v9 = vld [vmem:[#allocation5 + $0x20] sm:$0xff]  ;;  %s590_s19 = scalar_lea.vmem %s296_s18, 256  ;;  %p595_p5 = scmp.lt.s32.totalorder %s296_s18, %s296_s18 }
  0x4c   :  { %417 = vmatprep.subr.bf16.mxu1 %v416_v3  ;;  %v448_v10 = vpack.c.bf16 %v187_v7, %v186_v6  ;;  %v189_v11 = vld [vmem:[#allocation8 + $0x18] sm:$0xff]  ;;  %v190_v14 = vld [vmem:[#allocation8 + $0x20] sm:$0xff]  ;;  %v191_v15 = vld [vmem:[#allocation8 + $0x28] sm:$0xff]  ;;  %p591_p4 = scmp.ne.s32.totalorder %s296_s18, %s590_s19  ;;  %p596_p6 = scmp.lt.s32.totalorder %s590_s19, %s590_s19 }
  0x4d   :  { %419 = vmatpush3.bf16.xpose.msra.mxu1 %v416_v3  ;;  %v91_v12 = vld [vmem:[#allocation5 + $0x28] sm:$0xff]  ;;  %v452_v13 = vpack.c.bf16 %v189_v11, %v188_v8  ;;  %v456_v17 = vpack.c.bf16 %v191_v15, %v190_v14  ;;  %v84_v18 = vld [vmem:[#allocation2] sm:$0xff]  ;;  %v192_v19 = vld [vmem:[#allocation8 + $0x30] sm:$0xff] }
  0x4e   :  { %421 = vmatprep.subr.bf16.mxu1 %v420_v5  ;;  %449 = vmatprep.subr.bf16.mxu0 %v448_v10  ;;  %v424_v16 = vpack.c.bf16 %v91_v12, %v90_v9  ;;  %v193_v20 = vld [vmem:[#allocation8 + $0x38] sm:$0xff]  ;;  %v184_v21 = vld [vmem:[#allocation7] sm:$0xff]  ;;  %v92_v22 = vld [vmem:[#allocation5 + $0x30] sm:$0xff]  ;;  %p597_p7 = por %p596_p6, %p595_p5 }
  0x4f   :  { %451 = vmatpush3.bf16.msra.mxu0 %v448_v10  ;;  %378 = vmatprep.mubr.f32.mxu1 %v84_v18  ;;  %v460_v23 = vpack.c.bf16 %v193_v20, %v192_v19  ;;  %v93_v24 = vld [vmem:[#allocation5 + $0x38] sm:$0xff]  ;;  %v194_v25 = vld [vmem:[#allocation8 + $0x40] sm:$0xff]  ;;  %v196_v29 = vld [vmem:[#allocation8 + $0x50] sm:$0xff] }
  0x50   :  { %453 = vmatprep.subr.bf16.mxu0 %v452_v13  ;;  %v195_v26 = vld [vmem:[#allocation8 + $0x48] sm:$0xff]  ;;  %413 = vmatprep.mubr.f32.mxu0 %v184_v21  ;;  %v428_v27 = vpack.c.bf16 %v93_v24, %v92_v22  ;;  %v197_v30 = vld [vmem:[#allocation8 + $0x58] sm:$0xff]  ;;  %v94_v31 = vld [vmem:[#allocation5 + $0x40] sm:$0xff]  ;;  %p598_p8 = pnand %p597_p7, %p591_p4 }
  0x51   :  { %v464_v28 = vpack.c.bf16 %v195_v26, %v194_v25  ;;  %v468_v32 = vpack.c.bf16 %v197_v30, %v196_v29  ;;  %v95_v33 = vld [vmem:[#allocation5 + $0x48] sm:$0xff]  ;;  %v198_v34 = vld [vmem:[#allocation8 + $0x60] sm:$0xff]  ;;  %v199_v35 = vld [vmem:[#allocation8 + $0x68] sm:$0xff] }
  0x52   :  { %v432_v36 = vpack.c.bf16 %v95_v33, %v94_v31  ;;  %v472_v37 = vpack.c.bf16 %v199_v35, %v198_v34  ;;  %v200_v38 = vld [vmem:[#allocation8 + $0x70] sm:$0xff]  ;;  %v201_v39 = vld [vmem:[#allocation8 + $0x78] sm:$0xff]  ;;  %v96_v41 = vld [vmem:[#allocation5 + $0x50] sm:$0xff] }
  0x53   :  { %455 = vmatpush3.bf16.msra.mxu0 %v452_v13  ;;  %v476_v40 = vpack.c.bf16 %v201_v39, %v200_v38  ;;  %v97_v42 = vld [vmem:[#allocation5 + $0x58] sm:$0xff]  ;;  %v185_v44 = vld [vmem:[#allocation7 + $0x8] sm:$0xff]  ;;  %v98_v45 = vld [vmem:[#allocation5 + $0x60] sm:$0xff] }
  0x54   :  { %457 = vmatprep.subr.bf16.mxu0 %v456_v17  ;;  %v436_v43 = vpack.c.bf16 %v97_v42, %v96_v41  ;;  %v99_v46 = vld [vmem:[#allocation5 + $0x68] sm:$0xff]  ;;  %v100_v48 = vld [vmem:[#allocation5 + $0x70] sm:$0xff]  ;;  %v101_v49 = vld [vmem:[#allocation5 + $0x78] sm:$0xff] }
  0x55   :  { %423 = vmatpush3.bf16.xpose.msra.mxu1 %v420_v5  ;;  %v440_v47 = vpack.c.bf16 %v99_v46, %v98_v45  ;;  %v444_v50 = vpack.c.bf16 %v101_v49, %v100_v48  ;;  %v85_v51 = vld [vmem:[#allocation2 + $0x8] sm:$0xff]  ;;  %v309_v56 = vld [vmem:[%s753_s4] ss:$0 sm:$0xff] }
  0x56   :  { %425 = vmatprep.subr.bf16.mxu1 %v424_v16 }
  0x57   :  { %459 = vmatpush3.bf16.msra.mxu0 %v456_v17 }
  0x58   :  { %461 = vmatprep.subr.bf16.mxu0 %v460_v23 }
  0x5b   :  { %463 = vmatpush3.bf16.msra.mxu0 %v460_v23 }
  0x5c   :  { %465 = vmatprep.subr.bf16.mxu0 %v464_v28 }
  0x5d   :  { %427 = vmatpush3.bf16.xpose.msra.mxu1 %v424_v16 }
  0x5e   :  { %429 = vmatprep.subr.bf16.mxu1 %v428_v27 }
  0x5f   :  { %467 = vmatpush3.bf16.msra.mxu0 %v464_v28 }
  0x60   :  { %469 = vmatprep.subr.bf16.mxu0 %v468_v32 }
  0x63   :  { %471 = vmatpush3.bf16.msra.mxu0 %v468_v32 }
  0x64   :  { %473 = vmatprep.subr.bf16.mxu0 %v472_v37 }
  0x65   :  { %431 = vmatpush3.bf16.xpose.msra.mxu1 %v428_v27 }
  0x66   :  { %433 = vmatprep.subr.bf16.mxu1 %v432_v36 }
  0x67   :  { %475 = vmatpush3.bf16.msra.mxu0 %v472_v37 }
  0x68   :  { %477 = vmatprep.subr.bf16.mxu0 %v476_v40 }
  0x6b   :  { %479 = vmatpush3.bf16.msra.mxu0 %v476_v40 }
  0x6d   :  { %435 = vmatpush3.bf16.xpose.msra.mxu1 %v432_v36 }
  0x6e   :  { %437 = vmatprep.subr.bf16.mxu1 %v436_v43  ;;  %414 = vmatmul.mubr.f32.vlgmr.msra.gmra.mrb[0].mxu0 %v185_v44 }
  0x75   :  { %439 = vmatpush3.bf16.xpose.msra.mxu1 %v436_v43 }
  0x76   :  { %441 = vmatprep.subr.bf16.mxu1 %v440_v47 }
  0x7d   :  { %443 = vmatpush3.bf16.xpose.msra.mxu1 %v440_v47 }
  0x7e   :  { %445 = vmatprep.subr.bf16.mxu1 %v444_v50 }
  0x85   :  { %447 = vmatpush3.bf16.xpose.msra.mxu1 %v444_v50 }
  0x8c   :  { %379 = vmatmul.mubr.f32.vlgmr.msra.gmra.mrb[0].mxu1 %v85_v51 }
 0x141   :  { %v415_v52 = vpop.f32.mrb[0].mxu0 }
 0x142   :  { %v277_v53 = vpop.f32.mrb[1].mxu0 }
 0x15f   :  { %v380_v54 = vpop.f32.mrb[0].mxu1 }
 0x160   :  { %v168_v55 = vpop.f32.mrb[1].mxu1  ;;  %v483_v57 = vadd.f32 %v415_v52, %v380_v54 }
 0x161   :  { %v490_v58 = vadd.f32 %v277_v53, %v168_v55 }
 0x162   :  { %v486_v59 = vadd.f32 %v483_v57, %v309_v56 }
 0x163   :  { %v493_v60 = vadd.f32 %v490_v58, %v309_v56 }
 0x164   :  { %289 = vst [vmem:[#allocation10 + $0x8] sm:$0xff] %v486_v59 }
 0x165   :  { %288 = vst [vmem:[#allocation10] sm:$0xff] %v493_v60 }
 0x166   :  { %601 = shalt.err (!%p598_p8)
}
 0x167   :  { %s602_s4 = scalar_lea.hbm %s754_s5, 256 }
 0x168   :  { %p603_p9 = scmp.ne.s32.totalorder %s754_s5, %s602_s4  ;;  %p606_p10 = scmp.lt.u32.totalorder %s602_s4, %s754_s5 }
 0x16a   :  { %p608_p11 = pnand %p606_p10, %p603_p9 }
 0x16c   :  { %611 = shalt.err (!%p608_p11)
}
 0x16d   :  { %301 = dma.vmem_to_hbm [thread:$0]  %s296_s18, 256, %s754_s5, [#allocation4], %s622_s30, %s622_s30, %s623_s6  }
 0x16e   :  { %618 = dma.done.wait [#allocation4], 256  }
 0x16f   :  { %619 = vsyncadd [#allocation4], 4294967040 }
 0x170   :  { %305 = vsyncpa [#allocation3], 1 }
 0x171   :  { %306 = vsyncpa [#allocation6], 1 }
 0x172   :  { %307 = vsyncpa [#allocation9], 1 }
 0x173   :  { %308 = vsyncpa [#allocation4], 1 }

</bundles_post_ra>
